<compile_context>
chip_gen: v7x
topology: tpu7x:2x2x1
jax: 0.10.0
libtpu: 0.0.40
codegen_flags: <defaults>
</compile_context>

<pallas_src>
import jax
import jax.numpy as jnp
from jax.experimental import pallas as pl
from jax.experimental.pallas import tpu as pltpu


def _round_up(x, m):
    return (x + m - 1) // m * m


def _cdiv(a, b):
    return (a + b - 1) // b


def _actor_kernel(ma_ref,
                  state_ref,
                  w1_ref, b1_ref,
                  w2_ref, b2_ref,
                  w3_ref, b3_ref,
                  out_ref):
    # state tile is already bf16 (pre-cast in wrapper); f32 accumulation.
    x = state_ref[...]

    # l1 + relu
    h1 = jnp.dot(x, w1_ref[...], preferred_element_type=jnp.float32)
    h1 = jnp.maximum(h1 + b1_ref[...], 0.0)

    # l2 + relu
    h2 = jnp.dot(h1.astype(jnp.bfloat16), w2_ref[...],
                 preferred_element_type=jnp.float32)
    h2 = jnp.maximum(h2 + b2_ref[...], 0.0)

    # l3 + tanh, scaled by max_action (SMEM scalar)
    a = jnp.dot(h2.astype(jnp.bfloat16), w3_ref[...],
                preferred_element_type=jnp.float32)
    a = a + b3_ref[...]
    out_ref[...] = (ma_ref[0] * jnp.tanh(a)).astype(out_ref.dtype)


def prepare_actor_params(params):
    """Pad hidden dim to a lane multiple and cast weights to bf16 ONCE.

    Input params (PyTorch-semantics, stored transposed as (in, out)):
      w1 (S,H)  b1 (1,H)  w2 (H,H)  b2 (1,H)  w3 (H,A)  b3 (1,A)
    Zero padding of the hidden dim is exact for this MLP (relu(0)=0 and the
    padded weight rows/cols contribute nothing).
    """
    w1, b1 = params["w1"], params["b1"]
    w2, b2 = params["w2"], params["b2"]
    w3, b3 = params["w3"], params["b3"]

    S, H = w1.shape
    A = w3.shape[1]
    H_p = _round_up(H, 128)

    def pad2(a, rows, cols):
        return jnp.pad(a, ((0, rows - a.shape[0]), (0, cols - a.shape[1])))

    return {
        "w1": pad2(w1, S, H_p).astype(jnp.bfloat16),
        "b1": pad2(b1, 1, H_p).astype(jnp.float32),
        "w2": pad2(w2, H_p, H_p).astype(jnp.bfloat16),
        "b2": pad2(b2, 1, H_p).astype(jnp.float32),
        "w3": pad2(w3, H_p, A).astype(jnp.bfloat16),
        "b3": b3.astype(jnp.float32),
        "state_dim": S,
        "hidden_dim_padded": H_p,
        "action_dim": A,
    }


def actor_forward(state, prepared, max_action=1.0, block_b=2048):
    """Actor forward pass as a batch-tiled Pallas kernel.

    state    : (B, state_dim) float32
    prepared : output of prepare_actor_params (pre-padded bf16 weights).
    """
    w1, b1 = prepared["w1"], prepared["b1"]
    w2, b2 = prepared["w2"], prepared["b2"]
    w3, b3 = prepared["w3"], prepared["b3"]

    B, S = state.shape
    assert S == prepared["state_dim"]
    H_p = prepared["hidden_dim_padded"]
    A = prepared["action_dim"]

    # Batch tile: big steps (amortize ~0.35us/step overhead) with minimal
    # padded-row waste.  TB is a multiple of 8 and capped by block_b; keep
    # block_b <= ~2048-4096 so double-buffered tiles fit v7x VMEM defaults.
    n_tiles = max(1, _cdiv(B, block_b))
    TB = _round_up(_cdiv(B, n_tiles), 8)
    B_p = _round_up(B, TB)

    # Pre-cast state to bf16 (halves state DMA); padded rows are sliced off.
    state_p = jnp.pad(state, ((0, B_p - B), (0, 0))).astype(jnp.bfloat16)

    ma = jnp.asarray([max_action], dtype=jnp.float32)

    grid = (B_p // TB,)
    const = lambda i: (0, 0)   # weights/biases: same block every step -> resident

    in_specs = [
        pl.BlockSpec(memory_space=pltpu.MemorySpace.SMEM),   # max_action scalar
        pl.BlockSpec((TB, S), lambda i: (i, 0)),              # state tile (native S)
        pl.BlockSpec((S, H_p), const),                        # w1
        pl.BlockSpec((1, H_p), const),                        # b1
        pl.BlockSpec((H_p, H_p), const),                      # w2
        pl.BlockSpec((1, H_p), const),                        # b2
        pl.BlockSpec((H_p, A), const),                        # w3 (native A)
        pl.BlockSpec((1, A), const),                          # b3
    ]
    out_specs = pl.BlockSpec((TB, A), lambda i: (i, 0))        # unpadded action dim

    flops = 2 * B_p * (S * H_p + H_p * H_p + H_p * A)
    bytes_accessed = (
        state_p.size * 2                                       # bf16 state
        + B_p * A * 4                                          # f32 output
        + (w1.size + w2.size + w3.size) * 2                    # bf16 weights
        + (b1.size + b2.size + b3.size) * 4                    # f32 biases
    )

    out_p = pl.pallas_call(
        _actor_kernel,
        out_shape=jax.ShapeDtypeStruct((B_p, A), jnp.float32),
        grid=grid,
        in_specs=in_specs,
        out_specs=out_specs,
        compiler_params=pltpu.CompilerParams(
            dimension_semantics=("parallel",)),
        cost_estimate=pl.CostEstimate(
            flops=flops,
            transcendentals=B_p * A,
            bytes_accessed=bytes_accessed),
    )(ma, state_p, w1, b1, w2, b2, w3, b3)

    return out_p[:B]


def init_actor_params(key, state_dim, action_dim, hidden_dim=256):
    """Deterministic init mimicking PyTorch nn.Linear defaults
    (uniform +-1/sqrt(fan_in)); weights stored as (in, out)."""
    def linear(k, fan_in, fan_out):
        kw, kb = jax.random.split(k)
        bound = 1.0 / jnp.sqrt(jnp.float32(fan_in))
        w = jax.random.uniform(kw, (fan_in, fan_out), jnp.float32, -bound, bound)
        b = jax.random.uniform(kb, (1, fan_out), jnp.float32, -bound, bound)
        return w, b

    k1, k2, k3 = jax.random.split(key, 3)
    w1, b1 = linear(k1, state_dim, hidden_dim)
    w2, b2 = linear(k2, hidden_dim, hidden_dim)
    w3, b3 = linear(k3, hidden_dim, action_dim)
    return {"w1": w1, "b1": b1, "w2": w2, "b2": b2, "w3": w3, "b3": b3}


def actor_reference(state, params, max_action=1.0):
    """Pure-JAX f32 reference (matches the PyTorch module semantics)."""
    h = jnp.maximum(state @ params["w1"] + params["b1"], 0.0)
    h = jnp.maximum(h @ params["w2"] + params["b2"], 0.0)
    return max_action * jnp.tanh(h @ params["w3"] + params["b3"])


def actor_reference_bf16(state, params, max_action=1.0):
    """Pure-JAX reference using the same bf16-operand / f32-accumulate path."""
    bf = jnp.bfloat16
    h = jnp.dot(state.astype(bf), params["w1"].astype(bf),
                preferred_element_type=jnp.float32) + params["b1"]
    h = jnp.maximum(h, 0.0)
    h = jnp.dot(h.astype(bf), params["w2"].astype(bf),
                preferred_element_type=jnp.float32) + params["b2"]
    h = jnp.maximum(h, 0.0)
    a = jnp.dot(h.astype(bf), params["w3"].astype(bf),
                preferred_element_type=jnp.float32) + params["b3"]
    return max_action * jnp.tanh(a)


if __name__ == "__main__":
    batch = 2
    state_dim = 16
    action_dim = 4
    hidden_dim = 32
    max_action = 1.0

    key = jax.random.PRNGKey(0)
    key_params, key_state = jax.random.split(key)

    params = init_actor_params(key_params, state_dim, action_dim, hidden_dim)
    prepared = prepare_actor_params(params)
    state = jax.random.normal(key_state, (batch, state_dim), dtype=jnp.float32)

    out = actor_forward(state, prepared, max_action)
    out = jax.block_until_ready(out)
    assert out.shape == (batch, action_dim)

    # Tight check against a reference that uses the same bf16-operand path.
    ref_bf16 = actor_reference_bf16(state, params, max_action)
    assert jnp.allclose(out, ref_bf16, atol=1e-3, rtol=1e-3), "mismatch vs bf16 ref"

    # Loose check against the full-f32 PyTorch-semantics reference.
    ref_f32 = actor_reference(state, params, max_action)
    assert jnp.allclose(out, ref_f32, atol=5e-2, rtol=5e-2), "mismatch vs f32 ref"

    print("KERNEL_OK")
</pallas_src>

<mosaic_0001>
module attributes {stable_mosaic.version = 11 : i64} {
  func.func @_actor_kernel(%arg0: i32, %arg1: memref<1xf32, #tpu.memory_space<smem>>, %arg2: memref<8x16xbf16, #tpu.memory_space<vmem>>, %arg3: memref<16x128xbf16, #tpu.memory_space<vmem>>, %arg4: memref<1x128xf32, #tpu.memory_space<vmem>>, %arg5: memref<128x128xbf16, #tpu.memory_space<vmem>>, %arg6: memref<1x128xf32, #tpu.memory_space<vmem>>, %arg7: memref<128x4xbf16, #tpu.memory_space<vmem>>, %arg8: memref<1x4xf32, #tpu.memory_space<vmem>>, %arg9: memref<8x4xf32, #tpu.memory_space<vmem>>) attributes {dimension_semantics = [#tpu.dimension_semantics<parallel>], iteration_bounds = array<i64: 1>, scalar_prefetch = 0 : i64, scratch_operands = 0 : i64, tpu.core_type = #tpu.core_type<tc>, window_params = [{transform_indices = @transform_0, window_bounds = array<i64: 1>}, {transform_indices = @transform_1, window_bounds = array<i64: 8, 16>}, {pipeline_mode = #tpu.pipeline_mode<synchronous>, transform_indices = @transform_2, window_bounds = array<i64: 16, 128>}, {pipeline_mode = #tpu.pipeline_mode<synchronous>, transform_indices = @transform_3, window_bounds = array<i64: 1, 128>}, {pipeline_mode = #tpu.pipeline_mode<synchronous>, transform_indices = @transform_4, window_bounds = array<i64: 128, 128>}, {pipeline_mode = #tpu.pipeline_mode<synchronous>, transform_indices = @transform_5, window_bounds = array<i64: 1, 128>}, {pipeline_mode = #tpu.pipeline_mode<synchronous>, transform_indices = @transform_6, window_bounds = array<i64: 128, 4>}, {pipeline_mode = #tpu.pipeline_mode<synchronous>, transform_indices = @transform_7, window_bounds = array<i64: 1, 4>}, {transform_indices = @transform_8, window_bounds = array<i64: 8, 4>}]} {
    %c0 = arith.constant 0 : index
    %c0_0 = arith.constant 0 : index
    %0 = vector.load %arg2[%c0, %c0_0] : memref<8x16xbf16, #tpu.memory_space<vmem>>, vector<8x16xbf16>
    %c0_1 = arith.constant 0 : index
    %c0_2 = arith.constant 0 : index
    %1 = vector.load %arg3[%c0_1, %c0_2] : memref<16x128xbf16, #tpu.memory_space<vmem>>, vector<16x128xbf16>
    %cst = arith.constant dense<0.000000e+00> : vector<8x128xf32>
    %2 = tpu.matmul %0, %1, %cst {dimension_numbers = #tpu.dot_dimension_numbers<[1], [0], [0], [1], [0, 0, 1, 1], [], []>} : vector<8x16xbf16>, vector<16x128xbf16>, vector<8x128xf32> -> vector<8x128xf32>
    %c0_3 = arith.constant 0 : index
    %c0_4 = arith.constant 0 : index
    %3 = vector.load %arg4[%c0_3, %c0_4] : memref<1x128xf32, #tpu.memory_space<vmem>>, vector<1x128xf32>
    %4 = vector.broadcast %3 : vector<1x128xf32> to vector<8x128xf32>
    %5 = arith.addf %2, %4 : vector<8x128xf32>
    %cst_5 = arith.constant 0.000000e+00 : f32
    %6 = vector.broadcast %cst_5 : f32 to vector<8x128xf32>
    %7 = arith.maximumf %5, %6 : vector<8x128xf32>
    %8 = arith.truncf %7 : vector<8x128xf32> to vector<8x128xbf16>
    %c0_6 = arith.constant 0 : index
    %c0_7 = arith.constant 0 : index
    %9 = vector.load %arg5[%c0_6, %c0_7] : memref<128x128xbf16, #tpu.memory_space<vmem>>, vector<128x128xbf16>
    %cst_8 = arith.constant dense<0.000000e+00> : vector<8x128xf32>
    %10 = tpu.matmul %8, %9, %cst_8 {dimension_numbers = #tpu.dot_dimension_numbers<[1], [0], [0], [1], [0, 0, 1, 1], [], []>} : vector<8x128xbf16>, vector<128x128xbf16>, vector<8x128xf32> -> vector<8x128xf32>
    %c0_9 = arith.constant 0 : index
    %c0_10 = arith.constant 0 : index
    %11 = vector.load %arg6[%c0_9, %c0_10] : memref<1x128xf32, #tpu.memory_space<vmem>>, vector<1x128xf32>
    %12 = vector.broadcast %11 : vector<1x128xf32> to vector<8x128xf32>
    %13 = arith.addf %10, %12 : vector<8x128xf32>
    %cst_11 = arith.constant 0.000000e+00 : f32
    %14 = vector.broadcast %cst_11 : f32 to vector<8x128xf32>
    %15 = arith.maximumf %13, %14 : vector<8x128xf32>
    %16 = arith.truncf %15 : vector<8x128xf32> to vector<8x128xbf16>
    %c0_12 = arith.constant 0 : index
    %c0_13 = arith.constant 0 : index
    %17 = vector.load %arg7[%c0_12, %c0_13] : memref<128x4xbf16, #tpu.memory_space<vmem>>, vector<128x4xbf16>
    %cst_14 = arith.constant dense<0.000000e+00> : vector<8x4xf32>
    %18 = tpu.matmul %16, %17, %cst_14 {dimension_numbers = #tpu.dot_dimension_numbers<[1], [0], [0], [1], [0, 0, 1, 1], [], []>} : vector<8x128xbf16>, vector<128x4xbf16>, vector<8x4xf32> -> vector<8x4xf32>
    %c0_15 = arith.constant 0 : index
    %c0_16 = arith.constant 0 : index
    %19 = vector.load %arg8[%c0_15, %c0_16] : memref<1x4xf32, #tpu.memory_space<vmem>>, vector<1x4xf32>
    %20 = vector.broadcast %19 : vector<1x4xf32> to vector<8x4xf32>
    %21 = arith.addf %18, %20 : vector<8x4xf32>
    %c0_17 = arith.constant 0 : index
    %22 = memref.load %arg1[%c0_17] : memref<1xf32, #tpu.memory_space<smem>>
    %23 = math.tanh %21 : vector<8x4xf32>
    %24 = vector.broadcast %22 : f32 to vector<8x4xf32>
    %25 = arith.mulf %24, %23 : vector<8x4xf32>
    %c0_18 = arith.constant 0 : index
    %c0_19 = arith.constant 0 : index
    %26 = vector.load %arg9[%c0_18, %c0_19] : memref<8x4xf32, #tpu.memory_space<vmem>>, vector<8x4xf32>
    tpu.vector_store %arg9[%c0_18, %c0_19], %25 {strides = array<i32>} : memref<8x4xf32, #tpu.memory_space<vmem>>, vector<8x4xf32>,
    return
  }
  func.func @transform_0(%arg0: i32) -> i32 {
    %c0_i32 = arith.constant 0 : i32
    %c0_i32_0 = arith.constant 0 : i32
    return %c0_i32 : i32
  }
  func.func @transform_1(%arg0: i32) -> (i32, i32) {
    %c0_i32 = arith.constant 0 : i32
    %c0_i32_0 = arith.constant 0 : i32
    return %arg0, %c0_i32 : i32, i32
  }
  func.func @transform_2(%arg0: i32) -> (i32, i32) {
    %c0_i32 = arith.constant 0 : i32
    %c0_i32_0 = arith.constant 0 : i32
    %c0_i32_1 = arith.constant 0 : i32
    return %c0_i32, %c0_i32_0 : i32, i32
  }
  func.func @transform_3(%arg0: i32) -> (i32, i32) {
    %c0_i32 = arith.constant 0 : i32
    %c0_i32_0 = arith.constant 0 : i32
    %c0_i32_1 = arith.constant 0 : i32
    return %c0_i32, %c0_i32_0 : i32, i32
  }
  func.func @transform_4(%arg0: i32) -> (i32, i32) {
    %c0_i32 = arith.constant 0 : i32
    %c0_i32_0 = arith.constant 0 : i32
    %c0_i32_1 = arith.constant 0 : i32
    return %c0_i32, %c0_i32_0 : i32, i32
  }
  func.func @transform_5(%arg0: i32) -> (i32, i32) {
    %c0_i32 = arith.constant 0 : i32
    %c0_i32_0 = arith.constant 0 : i32
    %c0_i32_1 = arith.constant 0 : i32
    return %c0_i32, %c0_i32_0 : i32, i32
  }
  func.func @transform_6(%arg0: i32) -> (i32, i32) {
    %c0_i32 = arith.constant 0 : i32
    %c0_i32_0 = arith.constant 0 : i32
    %c0_i32_1 = arith.constant 0 : i32
    return %c0_i32, %c0_i32_0 : i32, i32
  }
  func.func @transform_7(%arg0: i32) -> (i32, i32) {
    %c0_i32 = arith.constant 0 : i32
    %c0_i32_0 = arith.constant 0 : i32
    %c0_i32_1 = arith.constant 0 : i32
    return %c0_i32, %c0_i32_0 : i32, i32
  }
  func.func @transform_8(%arg0: i32) -> (i32, i32) {
    %c0_i32 = arith.constant 0 : i32
    %c0_i32_0 = arith.constant 0 : i32
    return %arg0, %c0_i32 : i32, i32
  }
}

</mosaic_0001>

<bundles_post_ra>
// kernel: tpu_custom_call.1
= control target key start
LH: loop header
LB: loop body
LE: loop exit
PB: predicated region body
PF: predicated region fallthrough
CT: control target
= control target key end

     0   :  { %v435_v0 = vmov 0.0   ;;  %vm436_vm0 = vmmov 0   ;;  %vm47_vm1 = vcmask 130048   ;;  %vm321_vm2 = vcmask 31744   ;;  %s571_s2 = inlined_call_operand.vmem [shape: bf16[16,128], index: 2, kind: input, shape index: {}]   ;;  %s572_s1 = inlined_call_operand.vmem [shape: bf16[8,16], index: 1, kind: input, shape index: {}]   ;;  %s573_s4 = inlined_call_operand.vmem [shape: bf16[128,128], index: 4, kind: input, shape index: {}]   ;;  %s574_s6 = inlined_call_operand.vmem [shape: bf16[128,4], index: 6, kind: input, shape index: {}]   ;;  %s575_s3 = inlined_call_operand.vmem [shape: f32[1,128], index: 3, kind: input, shape index: {}]   ;;  %s576_s5 = inlined_call_operand.vmem [shape: f32[1,128], index: 5, kind: input, shape index: {}]   ;;  %s577_s7 = inlined_call_operand.vmem [shape: f32[1,4], index: 7, kind: input, shape index: {}]   ;;  %s578_s0 = inlined_call_operand.<no memory space> [shape: f32[1], index: 0, kind: input, shape index: {}]   ;;  %s579_s8 = inlined_call_operand.vmem [shape: f32[8,4], index: 8, kind: output, shape index: {}]  }
   0x1   :  { %368 = vmatprep.subr.bf16.mxu0 %v435_v0  ;;  %v416_v1 = vld [vmem:[%s571_s2] sm:$0xff]   ;;  %370 = vmatprep.mubr.msk.bf16.mxu0 %vm436_vm0, %v435_v0  ;;  %v418_v4 = vld [vmem:[%s573_s4 + $0x8] sm:$0xff]   ;;  %v419_v5 = vld [vmem:[%s573_s4 + $0x10] sm:$0xff]   ;;  %v319_v41 = vstv %s578_s0 }
   0x2   :  { %v31_v2 = vld [vmem:[%s572_s1] sm:$0xf]  ;;  %374 = vmatprep.subr.bf16.mxu1 %v435_v0  ;;  %390 = vmatprep.mubr.msk.bf16.mxu1 %vm436_vm0, %v435_v0  ;;  %v420_v6 = vld [vmem:[%s573_s4 + $0x18] sm:$0xff]   ;;  %v422_v8 = vld [vmem:[%s573_s4 + $0x28] sm:$0xff]  }
   0x3   :  { %369 = vmatpush3.bf16.msra.mxu0 %v416_v1  ;;  %v417_v3 = vld [vmem:[%s573_s4] sm:$0xff]   ;;  %v423_v9 = vld [vmem:[%s573_s4 + $0x30] sm:$0xff]   ;;  %v424_v10 = vld [vmem:[%s573_s4 + $0x38] sm:$0xff]  }
   0x4   :  { %394 = vmatprep.subr.bf16.mxu0 %v435_v0  ;;  %375 = vmatpush3.bf16.msra.mxu1 %v417_v3  ;;  %v421_v7 = vld [vmem:[%s573_s4 + $0x20] sm:$0xff]   ;;  %v426_v12 = vld [vmem:[%s574_s6 + $0x8] sm:$0xff]   ;;  %v427_v13 = vld [vmem:[%s574_s6 + $0x10] sm:$0xff]  }
   0x5   :  { %376 = vmatprep.subr.bf16.mxu1 %v435_v0  ;;  %v425_v11 = vld [vmem:[%s574_s6] sm:$0xff]   ;;  %v428_v14 = vld [vmem:[%s574_s6 + $0x18] sm:$0xff]   ;;  %v430_v16 = vld [vmem:[%s574_s6 + $0x28] sm:$0xff]  }
   0x6   :  { %371 = vmatmul.mubr.msk.bf16.vlgmr.msra.gmra.mrb[0].mxu0 %vm47_vm1, %v31_v2  ;;  %v429_v15 = vld [vmem:[%s574_s6 + $0x20] sm:$0xff]   ;;  %v431_v25 = vld [vmem:[%s574_s6 + $0x30] sm:$0xff]   ;;  %v432_v26 = vld [vmem:[%s574_s6 + $0x38] sm:$0xff]  }
   0x7   :  { %410 = vmatprep.mubr.msk.bf16.mxu0 %vm436_vm0, %v435_v0  ;;  %395 = vmatpush3.bf16.msra.mxu0 %v425_v11  ;;  %v327_v17 = vld [vmem:[%s575_s3] ss:$0 sm:$0xff] }
   0x8   :  { %377 = vmatpush3.bf16.msra.mxu1 %v418_v4  ;;  %396 = vmatprep.subr.bf16.mxu0 %v435_v0  ;;  %v330_v27 = vld [vmem:[%s576_s5] ss:$0 sm:$0xff] }
   0x9   :  { %378 = vmatprep.subr.bf16.mxu1 %v435_v0  ;;  %v339_v35 = vld [vmem:[%s577_s7] ss:$0 sm:$0xff] }
   0xb   :  { %397 = vmatpush3.bf16.msra.mxu0 %v426_v12 }
   0xc   :  { %379 = vmatpush3.bf16.msra.mxu1 %v419_v5  ;;  %398 = vmatprep.subr.bf16.mxu0 %v435_v0 }
   0xd   :  { %380 = vmatprep.subr.bf16.mxu1 %v435_v0 }
   0xf   :  { %399 = vmatpush3.bf16.msra.mxu0 %v427_v13 }
  0x10   :  { %381 = vmatpush3.bf16.msra.mxu1 %v420_v6  ;;  %400 = vmatprep.subr.bf16.mxu0 %v435_v0 }
  0x11   :  { %382 = vmatprep.subr.bf16.mxu1 %v435_v0 }
  0x13   :  { %401 = vmatpush3.bf16.msra.mxu0 %v428_v14 }
  0x14   :  { %383 = vmatpush3.bf16.msra.mxu1 %v421_v7  ;;  %402 = vmatprep.subr.bf16.mxu0 %v435_v0 }
  0x15   :  { %384 = vmatprep.subr.bf16.mxu1 %v435_v0 }
  0x17   :  { %403 = vmatpush3.bf16.msra.mxu0 %v429_v15 }
  0x18   :  { %385 = vmatpush3.bf16.msra.mxu1 %v422_v8  ;;  %404 = vmatprep.subr.bf16.mxu0 %v435_v0 }
  0x19   :  { %386 = vmatprep.subr.bf16.mxu1 %v435_v0 }
  0x1b   :  { %405 = vmatpush3.bf16.msra.mxu0 %v430_v16 }
  0x1c   :  { %387 = vmatpush3.bf16.msra.mxu1 %v423_v9  ;;  %406 = vmatprep.subr.bf16.mxu0 %v435_v0 }
  0x1d   :  { %388 = vmatprep.subr.bf16.mxu1 %v435_v0 }
  0x1f   :  { %407 = vmatpush3.bf16.msra.mxu0 %v431_v25 }
  0x20   :  { %389 = vmatpush3.bf16.msra.mxu1 %v424_v10  ;;  %408 = vmatprep.subr.bf16.mxu0 %v435_v0 }
  0x23   :  { %409 = vmatpush3.bf16.msra.mxu0 %v432_v26 }
  0xd9   :  { %v85_v18 = vpop.f32.mrb[0].mxu0 }
  0xda   :  { %v86_v19 = vadd.f32 %v327_v17, %v85_v18  ;;  %v372_v20 = vpop.f32.mrb[1].mxu0 }
  0xdb   :  { %v88_v21 = vpop.f32.mrb[2].mxu0 }
  0xdc   :  { %v91_v22 = vmax.f32 %v86_v19, 0.0  ;;  %v373_v23 = vpop.f32.mrb[3].mxu0 }
  0xde   :  { %v92_v24 = vpack.c.bf16 %v91_v22, %v91_v22 }
  0xe0   :  { %391 = vmatmul.mubr.bf16.vlgmr.msra.gmra.mrb[0].mxu1 %v92_v24 }
 0x1b3   :  { %v198_v28 = vpop.f32.mrb[0].mxu1 }
 0x1b4   :  { %v199_v29 = vadd.f32 %v330_v27, %v198_v28  ;;  %v392_v30 = vpop.f32.mrb[1].mxu1 }
 0x1b5   :  { %v201_v31 = vpop.f32.mrb[2].mxu1 }
 0x1b6   :  { %v204_v32 = vmax.f32 %v199_v29, 0.0  ;;  %v393_v33 = vpop.f32.mrb[3].mxu1 }
 0x1b8   :  { %v205_v34 = vpack.c.bf16 %v204_v32, %v204_v32 }
 0x1ba   :  { %411 = vmatmul.mubr.bf16.vlgmr.msra.gmra.mrb[4].mxu0 %v205_v34 }
 0x28d   :  { %v311_v36 = vpop.f32.mrb[4].mxu0 }
 0x28e   :  { %v312_v37 = vadd.f32 %v339_v35, %v311_v36  ;;  %v412_v38 = vpop.f32.mrb[5].mxu0 }
 0x28f   :  { %v314_v39 = vpop.f32.mrb[6].mxu0 }
 0x290   :  { %433 = vtanh.f32 %v312_v37  ;;  %v413_v40 = vpop.f32.mrb[7].mxu0 }
 0x29a   :  { %v434_v42 = vpop.eup %433 }
 0x29b   :  { %v320_v43 = vmul.f32 %v434_v42, %v319_v41 }
 0x29d   :  { %322 = vst.msk [vmem:[%s579_s8] sm:$0xff] %vm321_vm2, %v320_v43 }

</bundles_post_ra>
